<compile_context>
chip_gen: v5e
topology: v5e:2x2
jax: 0.10.0
libtpu: 0.0.40
codegen_flags: <defaults>
</compile_context>

<pallas_src>
import functools

import jax
import jax.numpy as jnp
from jax import lax
from jax.experimental import pallas as pl
from jax.experimental.pallas import tpu as pltpu


def _round_up(v, mult):
    return (v + mult - 1) // mult * mult


def _auto_config():
    """Per-generation tile / VMEM defaults."""
    kind = ""
    try:
        kind = jax.devices()[0].device_kind.lower()
    except Exception:  # pragma: no cover - defensive
        pass
    if "v7" in kind or "7x" in kind:
        # 64 MiB VMEM, ~3.2 TB/s, 2 TCs -> smaller weight chunks, headroom.
        return dict(tile_m=512, tile_h=256, vmem=52 * 1024 * 1024, cores=2)
    if "v6" in kind:
        # 918 TF/s / ~1.4 TB/s -> need big token tiles to be MXU-bound.
        return dict(tile_m=1024, tile_h=512, vmem=104 * 1024 * 1024, cores=1)
    if "v5p" in kind:
        return dict(tile_m=512, tile_h=512, vmem=96 * 1024 * 1024, cores=2)
    if "v5" in kind:  # v5e / v5 lite
        return dict(tile_m=512, tile_h=512, vmem=96 * 1024 * 1024, cores=1)
    return dict(tile_m=512, tile_h=512, vmem=64 * 1024 * 1024, cores=1)


def _pick_tile_h(hid_p, target):
    """Largest multiple of 128 <= target that divides hid_p (no padding waste)."""
    target = min(max(target, 128), hid_p)
    best = 128
    t = 128
    while t <= target:
        if hid_p % t == 0:
            best = t
        t += 128
    return best


def _est_vmem_bytes(tile_m, tile_h, in_p, out_p, x_isz, out_isz, c_isz):
    # Double-buffered input/output blocks + f32 accumulator + biases.
    return (2 * tile_m * in_p * x_isz
            + 2 * tile_h * in_p * c_isz
            + 2 * tile_h * out_p * c_isz
            + 2 * tile_m * out_p * out_isz
            + tile_m * out_p * 4
            + 2 * 8 * (tile_h + out_p) * 4)


def _mish(h):
    """mish(x) = x * tanh(softplus(x)); single exp + one EUP reciprocal.

    With u = exp(-|x|):
      x >= 0: tanh(softplus(x)) = (1 + 2u) / (1 + 2u + 2u^2)
      x <  0: tanh(softplus(x)) = (u^2 + 2u) / (u^2 + 2u + 2)
    Stable for all x.
    """
    u = jnp.exp(-jnp.abs(h))
    u2 = u * u
    pos = h >= 0.0
    num = jnp.where(pos, 1.0 + 2.0 * u, u2 + 2.0 * u)
    den = jnp.where(pos, 1.0 + 2.0 * u + 2.0 * u2, u2 + 2.0 * u + 2.0)
    return h * num * pl.reciprocal(den, approx=False)


def mlp_kernel(x_ref, w1t_ref, b1_ref, w2_ref, b2_ref, o_ref, acc_ref,
               *, compute_dtype):
    hb = pl.program_id(1)

    @pl.when(hb == 0)
    def _init():
        acc_ref[...] = jnp.zeros_like(acc_ref)

    # Cast x tile to the MXU dtype in-kernel (x is streamed in native dtype).
    x = x_ref[...].astype(compute_dtype)
    # fc1 chunk: (tm, in) x (th, in) contracted over 'in' -> (tm, th), f32 acc.
    h = lax.dot_general(x, w1t_ref[...],
                        dimension_numbers=(((1,), (1,)), ((), ())),
                        preferred_element_type=jnp.float32)
    h = h + b1_ref[...]
    a = _mish(h)
    # Dropout(p=0.0) -> identity.
    # fc2 chunk: (tm, th) @ (th, out), accumulated into f32 VMEM scratch.
    acc_ref[...] += jnp.dot(a.astype(w2_ref.dtype), w2_ref[...],
                            preferred_element_type=jnp.float32)

    @pl.when(hb == pl.num_programs(1) - 1)
    def _finalize():
        o_ref[...] = (acc_ref[...] + b2_ref[...]).astype(o_ref.dtype)


def prepare_mlp_weights(w1, b1, w2, b2, compute_dtype=jnp.bfloat16):
    """One-time weight prep (hoisted out of the per-call hot path):
    pad features to 128-lane multiples, cast to the MXU dtype, and store W1
    hidden-major so each hidden chunk is a contiguous leading-dim DMA."""
    in_f, hid = w1.shape
    assert w2.shape[0] == hid
    out_f = w2.shape[1]
    in_p = _round_up(in_f, 128)
    hid_p = _round_up(hid, 128)
    out_p = _round_up(out_f, 128)
    cdt = jnp.dtype(compute_dtype)

    w1t = jnp.pad(jnp.asarray(w1).T.astype(cdt),
                  ((0, hid_p - hid), (0, in_p - in_f)))          # (hid_p, in_p)
    w2p = jnp.pad(jnp.asarray(w2).astype(cdt),
                  ((0, hid_p - hid), (0, out_p - out_f)))        # (hid_p, out_p)
    # b1 padded with exact zeros => mish(0) == 0, padded hidden cols contribute nothing.
    b1p = jnp.pad(jnp.asarray(b1).astype(jnp.float32),
                  (0, hid_p - hid)).reshape(1, hid_p)
    b2p = jnp.pad(jnp.asarray(b2).astype(jnp.float32),
                  (0, out_p - out_f)).reshape(1, out_p)

    meta = dict(in_f=in_f, hid=hid, out_f=out_f,
                in_p=in_p, hid_p=hid_p, out_p=out_p, compute_dtype=cdt)
    return (w1t, b1p, w2p, b2p), meta


def mlp_pallas(x, weights, meta, *, tile_m=None, tile_h=None,
               vmem_limit_bytes=None):
    """x: (..., in_features) -> (..., out_features). Fused fc1 + Mish + fc2."""
    w1t, b1p, w2p, b2p = weights
    in_f, hid, out_f = meta["in_f"], meta["hid"], meta["out_f"]
    in_p, hid_p, out_p = meta["in_p"], meta["hid_p"], meta["out_p"]
    cdt = meta["compute_dtype"]

    cfg = _auto_config()
    tile_m = cfg["tile_m"] if tile_m is None else tile_m
    tile_h = cfg["tile_h"] if tile_h is None else tile_h
    vmem_limit_bytes = cfg["vmem"] if vmem_limit_bytes is None else vmem_limit_bytes
    cores = cfg["cores"]

    orig_shape = x.shape
    x2d = x.reshape(-1, in_f)
    m = x2d.shape[0]
    out_dtype = x.dtype
    x_isz = jnp.dtype(x.dtype).itemsize
    out_isz = jnp.dtype(out_dtype).itemsize
    c_isz = cdt.itemsize

    # Hidden chunk: divisor of the (128-padded) hidden dim -> no wasted cols.
    tile_h = _pick_tile_h(hid_p, tile_h)

    # Token tile: sublane multiple, clamped to the problem; on multi-TC chips
    # make sure the parallel axis has at least `cores` tiles.
    tile_m = min(_round_up(tile_m, 8), _round_up(m, 8))
    if cores >= 2 and m > 8:
        tile_m = min(tile_m, _round_up(-(-m // cores), 8))

    # VMEM budget guard: shrink tile_m (then tile_h) until the estimate fits.
    budget = int(0.75 * vmem_limit_bytes)
    while (_est_vmem_bytes(tile_m, tile_h, in_p, out_p, x_isz, out_isz, c_isz)
           > budget and tile_m > 8):
        tile_m = max(8, _round_up(tile_m // 2, 8))
    while (_est_vmem_bytes(tile_m, tile_h, in_p, out_p, x_isz, out_isz, c_isz)
           > budget and tile_h > 128):
        tile_h = _pick_tile_h(hid_p, tile_h // 2)

    m_p = _round_up(m, tile_m)

    # Pad x only when needed; keep native dtype (kernel casts to bf16).
    if (m_p, in_p) != (m, in_f):
        x2d = jnp.pad(x2d, ((0, m_p - m), (0, in_p - in_f)))

    grid = (m_p // tile_m, hid_p // tile_h)
    n_m_tiles = grid[0]

    cost = pl.CostEstimate(
        flops=2 * m_p * hid_p * (in_p + out_p),
        transcendentals=m_p * hid_p,
        bytes_accessed=(m_p * in_p * x_isz
                        + n_m_tiles * (w1t.size * c_isz + w2p.size * c_isz
                                       + b1p.size * 4 + b2p.size * 4)
                        + m_p * out_p * out_isz),
    )

    kernel = functools.partial(mlp_kernel, compute_dtype=cdt)

    out = pl.pallas_call(
        kernel,
        out_shape=jax.ShapeDtypeStruct((m_p, out_p), out_dtype),
        grid_spec=pltpu.PrefetchScalarGridSpec(
            num_scalar_prefetch=0,
            grid=grid,
            in_specs=[
                pl.BlockSpec((tile_m, in_p), lambda i, hb: (i, 0)),    # x tile
                pl.BlockSpec((tile_h, in_p), lambda i, hb: (hb, 0)),   # W1^T chunk (contiguous rows)
                pl.BlockSpec((1, tile_h), lambda i, hb: (0, hb)),      # b1 chunk
                pl.BlockSpec((tile_h, out_p), lambda i, hb: (hb, 0)),  # W2 chunk
                pl.BlockSpec((1, out_p), lambda i, hb: (0, 0)),        # b2
            ],
            out_specs=pl.BlockSpec((tile_m, out_p), lambda i, hb: (i, 0)),
            scratch_shapes=[pltpu.VMEM((tile_m, out_p), jnp.float32)],
        ),
        compiler_params=pltpu.CompilerParams(
            dimension_semantics=("parallel", "arbitrary"),
            vmem_limit_bytes=vmem_limit_bytes,
        ),
        cost_estimate=cost,
    )(x2d, w1t, b1p, w2p, b2p)

    return out[:m, :out_f].reshape(*orig_shape[:-1], out_f)


def mlp_reference(x, w1, b1, w2, b2):
    # Pure-f32 reference matching torch: fc1 -> Mish -> fc2 (dropout p=0.0).
    h = x @ w1 + b1
    sp = jnp.where(h > 20.0, h, jnp.log1p(jnp.exp(jnp.minimum(h, 20.0))))
    a = h * jnp.tanh(sp)
    return a @ w2 + b2


if __name__ == "__main__":
    # Small shapes consistent with the module: (batch, seq, in_features)
    batch, seq = 2, 8
    in_features, hidden_features, out_features = 32, 64, 32

    key = jax.random.PRNGKey(0)
    kx, kw1, kb1, kw2, kb2 = jax.random.split(key, 5)

    x = jax.random.normal(kx, (batch, seq, in_features), dtype=jnp.float32)

    # Deterministic parameter init (PyTorch Linear-style uniform bounds).
    bound1 = 1.0 / (in_features ** 0.5)
    w1 = jax.random.uniform(kw1, (in_features, hidden_features),
                            minval=-bound1, maxval=bound1, dtype=jnp.float32)
    b1 = jax.random.uniform(kb1, (hidden_features,),
                            minval=-bound1, maxval=bound1, dtype=jnp.float32)

    bound2 = 1.0 / (hidden_features ** 0.5)
    w2 = jax.random.uniform(kw2, (hidden_features, out_features),
                            minval=-bound2, maxval=bound2, dtype=jnp.float32)
    b2 = jax.random.uniform(kb2, (out_features,),
                            minval=-bound2, maxval=bound2, dtype=jnp.float32)

    # One-time weight prep (pad + cast + hidden-major W1), hoisted off the hot path.
    weights, meta = prepare_mlp_weights(w1, b1, w2, b2)

    y = mlp_pallas(x, weights, meta)
    y = jax.block_until_ready(y)

    y_ref = mlp_reference(x, w1, b1, w2, b2)
    assert y.shape == (batch, seq, out_features)
    # bf16 MXU operands -> bf16-level tolerance.
    assert jnp.allclose(y, y_ref, atol=5e-2, rtol=5e-2), "mismatch vs reference"

    print("KERNEL_OK")
</pallas_src>

<mosaic_0001>
module attributes {stable_mosaic.version = 11 : i64} {
  func.func @mlp_kernel(%arg0: i32, %arg1: i32, %arg2: memref<16x128xf32, #tpu.memory_space<vmem>>, %arg3: memref<128x128xbf16, #tpu.memory_space<vmem>>, %arg4: memref<1x128xf32, #tpu.memory_space<vmem>>, %arg5: memref<128x128xbf16, #tpu.memory_space<vmem>>, %arg6: memref<1x128xf32, #tpu.memory_space<vmem>>, %arg7: memref<16x128xf32, #tpu.memory_space<vmem>>, %arg8: memref<16x128xf32, #tpu.memory_space<vmem>>) attributes {dimension_semantics = [#tpu.dimension_semantics<parallel>, #tpu.dimension_semantics<arbitrary>], iteration_bounds = array<i64: 1, 1>, scalar_prefetch = 0 : i64, scratch_operands = 1 : i64, tpu.core_type = #tpu.core_type<tc>, window_params = [{transform_indices = @transform_0, window_bounds = array<i64: 16, 128>}, {transform_indices = @transform_1, window_bounds = array<i64: 128, 128>}, {transform_indices = @transform_2, window_bounds = array<i64: 1, 128>}, {transform_indices = @transform_3, window_bounds = array<i64: 128, 128>}, {pipeline_mode = #tpu.pipeline_mode<synchronous>, transform_indices = @transform_4, window_bounds = array<i64: 1, 128>}, {transform_indices = @transform_5, window_bounds = array<i64: 16, 128>}]} {
    %c0_i32 = arith.constant 0 : i32
    %0 = arith.cmpi eq, %arg1, %c0_i32 : i32
    %1 = arith.extui %0 : i1 to i32
    %c0_i32_0 = arith.constant 0 : i32
    %2 = arith.cmpi ne, %1, %c0_i32_0 : i32
    scf.if %2 {
      %cst_25 = arith.constant 0.000000e+00 : f32
      %50 = vector.broadcast %cst_25 : f32 to vector<16x128xf32>
      %c0_26 = arith.constant 0 : index
      %c0_27 = arith.constant 0 : index
      %51 = vector.load %arg8[%c0_26, %c0_27] : memref<16x128xf32, #tpu.memory_space<vmem>>, vector<16x128xf32>
      tpu.vector_store %arg8[%c0_26, %c0_27], %50 {strides = array<i32>} : memref<16x128xf32, #tpu.memory_space<vmem>>, vector<16x128xf32>,
    } else {
    }
    %c0 = arith.constant 0 : index
    %c0_1 = arith.constant 0 : index
    %3 = vector.load %arg2[%c0, %c0_1] : memref<16x128xf32, #tpu.memory_space<vmem>>, vector<16x128xf32>
    %4 = arith.truncf %3 : vector<16x128xf32> to vector<16x128xbf16>
    %c0_2 = arith.constant 0 : index
    %c0_3 = arith.constant 0 : index
    %5 = vector.load %arg3[%c0_2, %c0_3] : memref<128x128xbf16, #tpu.memory_space<vmem>>, vector<128x128xbf16>
    %cst = arith.constant dense<0.000000e+00> : vector<16x128xf32>
    %6 = tpu.matmul %4, %5, %cst {dimension_numbers = #tpu.dot_dimension_numbers<[1], [1], [0], [0], [0, 0, 1, 0], [], []>} : vector<16x128xbf16>, vector<128x128xbf16>, vector<16x128xf32> -> vector<16x128xf32>
    %c0_4 = arith.constant 0 : index
    %c0_5 = arith.constant 0 : index
    %7 = vector.load %arg4[%c0_4, %c0_5] : memref<1x128xf32, #tpu.memory_space<vmem>>, vector<1x128xf32>
    %8 = vector.broadcast %7 : vector<1x128xf32> to vector<16x128xf32>
    %9 = arith.addf %6, %8 : vector<16x128xf32>
    %10 = math.absf %9 : vector<16x128xf32>
    %cst_6 = arith.constant 0.000000e+00 : f32
    %11 = vector.broadcast %cst_6 : f32 to vector<16x128xf32>
    %12 = arith.subf %11, %10 : vector<16x128xf32>
    %13 = math.exp %12 : vector<16x128xf32>
    %14 = arith.mulf %13, %13 : vector<16x128xf32>
    %cst_7 = arith.constant 0.000000e+00 : f32
    %15 = vector.broadcast %cst_7 : f32 to vector<16x128xf32>
    %16 = arith.cmpf oge, %9, %15 : vector<16x128xf32>
    %cst_8 = arith.constant 2.000000e+00 : f32
    %17 = vector.broadcast %cst_8 : f32 to vector<16x128xf32>
    %18 = arith.mulf %17, %13 : vector<16x128xf32>
    %cst_9 = arith.constant 1.000000e+00 : f32
    %19 = vector.broadcast %cst_9 : f32 to vector<16x128xf32>
    %20 = arith.addf %19, %18 : vector<16x128xf32>
    %cst_10 = arith.constant 2.000000e+00 : f32
    %21 = vector.broadcast %cst_10 : f32 to vector<16x128xf32>
    %22 = arith.mulf %21, %13 : vector<16x128xf32>
    %23 = arith.addf %14, %22 : vector<16x128xf32>
    %24 = arith.select %16, %20, %23 : vector<16x128xi1>, vector<16x128xf32>
    %cst_11 = arith.constant 2.000000e+00 : f32
    %25 = vector.broadcast %cst_11 : f32 to vector<16x128xf32>
    %26 = arith.mulf %25, %13 : vector<16x128xf32>
    %cst_12 = arith.constant 1.000000e+00 : f32
    %27 = vector.broadcast %cst_12 : f32 to vector<16x128xf32>
    %28 = arith.addf %27, %26 : vector<16x128xf32>
    %cst_13 = arith.constant 2.000000e+00 : f32
    %29 = vector.broadcast %cst_13 : f32 to vector<16x128xf32>
    %30 = arith.mulf %29, %14 : vector<16x128xf32>
    %31 = arith.addf %28, %30 : vector<16x128xf32>
    %cst_14 = arith.constant 2.000000e+00 : f32
    %32 = vector.broadcast %cst_14 : f32 to vector<16x128xf32>
    %33 = arith.mulf %32, %13 : vector<16x128xf32>
    %34 = arith.addf %14, %33 : vector<16x128xf32>
    %cst_15 = arith.constant 2.000000e+00 : f32
    %35 = vector.broadcast %cst_15 : f32 to vector<16x128xf32>
    %36 = arith.addf %34, %35 : vector<16x128xf32>
    %37 = arith.select %16, %31, %36 : vector<16x128xi1>, vector<16x128xf32>
    %38 = arith.mulf %9, %24 : vector<16x128xf32>
    %39 = tpu.reciprocal %37 : vector<16x128xf32> -> vector<16x128xf32>
    %40 = arith.mulf %38, %39 : vector<16x128xf32>
    %c0_16 = arith.constant 0 : index
    %c0_17 = arith.constant 0 : index
    %41 = vector.load %arg8[%c0_16, %c0_17] : memref<16x128xf32, #tpu.memory_space<vmem>>, vector<16x128xf32>
    %42 = arith.truncf %40 : vector<16x128xf32> to vector<16x128xbf16>
    %c0_18 = arith.constant 0 : index
    %c0_19 = arith.constant 0 : index
    %43 = vector.load %arg5[%c0_18, %c0_19] : memref<128x128xbf16, #tpu.memory_space<vmem>>, vector<128x128xbf16>
    %cst_20 = arith.constant dense<0.000000e+00> : vector<16x128xf32>
    %44 = tpu.matmul %42, %43, %cst_20 {dimension_numbers = #tpu.dot_dimension_numbers<[1], [0], [0], [1], [0, 0, 1, 1], [], []>} : vector<16x128xbf16>, vector<128x128xbf16>, vector<16x128xf32> -> vector<16x128xf32>
    %45 = arith.addf %41, %44 : vector<16x128xf32>
    %c0_21 = arith.constant 0 : index
    %c0_22 = arith.constant 0 : index
    %46 = vector.load %arg8[%c0_21, %c0_22] : memref<16x128xf32, #tpu.memory_space<vmem>>, vector<16x128xf32>
    tpu.vector_store %arg8[%c0_21, %c0_22], %45 {strides = array<i32>} : memref<16x128xf32, #tpu.memory_space<vmem>>, vector<16x128xf32>,
    %c0_i32_23 = arith.constant 0 : i32
    %47 = arith.cmpi eq, %arg1, %c0_i32_23 : i32
    %48 = arith.extui %47 : i1 to i32
    %c0_i32_24 = arith.constant 0 : i32
    %49 = arith.cmpi ne, %48, %c0_i32_24 : i32
    scf.if %49 {
      %c0_25 = arith.constant 0 : index
      %c0_26 = arith.constant 0 : index
      %50 = vector.load %arg8[%c0_25, %c0_26] : memref<16x128xf32, #tpu.memory_space<vmem>>, vector<16x128xf32>
      %c0_27 = arith.constant 0 : index
      %c0_28 = arith.constant 0 : index
      %51 = vector.load %arg6[%c0_27, %c0_28] : memref<1x128xf32, #tpu.memory_space<vmem>>, vector<1x128xf32>
      %52 = vector.broadcast %51 : vector<1x128xf32> to vector<16x128xf32>
      %53 = arith.addf %50, %52 : vector<16x128xf32>
      %c0_29 = arith.constant 0 : index
      %c0_30 = arith.constant 0 : index
      %54 = vector.load %arg7[%c0_29, %c0_30] : memref<16x128xf32, #tpu.memory_space<vmem>>, vector<16x128xf32>
      tpu.vector_store %arg7[%c0_29, %c0_30], %53 {strides = array<i32>} : memref<16x128xf32, #tpu.memory_space<vmem>>, vector<16x128xf32>,
    } else {
    }
    return
  }
  func.func @transform_0(%arg0: i32, %arg1: i32) -> (i32, i32) {
    %c0_i32 = arith.constant 0 : i32
    %c0_i32_0 = arith.constant 0 : i32
    return %arg0, %c0_i32 : i32, i32
  }
  func.func @transform_1(%arg0: i32, %arg1: i32) -> (i32, i32) {
    %c0_i32 = arith.constant 0 : i32
    %c0_i32_0 = arith.constant 0 : i32
    return %arg1, %c0_i32 : i32, i32
  }
  func.func @transform_2(%arg0: i32, %arg1: i32) -> (i32, i32) {
    %c0_i32 = arith.constant 0 : i32
    %c0_i32_0 = arith.constant 0 : i32
    return %c0_i32, %arg1 : i32, i32
  }
  func.func @transform_3(%arg0: i32, %arg1: i32) -> (i32, i32) {
    %c0_i32 = arith.constant 0 : i32
    %c0_i32_0 = arith.constant 0 : i32
    return %arg1, %c0_i32 : i32, i32
  }
  func.func @transform_4(%arg0: i32, %arg1: i32) -> (i32, i32) {
    %c0_i32 = arith.constant 0 : i32
    %c0_i32_0 = arith.constant 0 : i32
    %c0_i32_1 = arith.constant 0 : i32
    return %c0_i32, %c0_i32_0 : i32, i32
  }
  func.func @transform_5(%arg0: i32, %arg1: i32) -> (i32, i32) {
    %c0_i32 = arith.constant 0 : i32
    %c0_i32_0 = arith.constant 0 : i32
    return %arg0, %c0_i32 : i32, i32
  }
}

</mosaic_0001>

<bundles_post_ra>
// kernel: tpu_custom_call.1
= control target key start
LH: loop header
LB: loop body
LE: loop exit
PB: predicated region body
PF: predicated region fallthrough
CT: control target
= control target key end

     0   :  { %10 = vsyncpa [#allocation4], 0  ;;  %s610_s0 = inlined_call_operand.hbm [shape: f32[16,128], index: 0, kind: input, shape index: {}]   ;;  %s611_s1 = inlined_call_operand.hbm [shape: bf16[128,128], index: 1, kind: input, shape index: {}]   ;;  %s612_s2 = inlined_call_operand.vmem [shape: f32[1,128], index: 2, kind: input, shape index: {}]   ;;  %s613_s3 = inlined_call_operand.hbm [shape: bf16[128,128], index: 3, kind: input, shape index: {}]   ;;  %s614_s4 = inlined_call_operand.vmem [shape: f32[1,128], index: 4, kind: input, shape index: {}]   ;;  %s615_s5 = inlined_call_operand.hbm [shape: f32[16,128], index: 5, kind: output, shape index: {}]  }
   0x1   :  { %11 = vsyncpa [#allocation7], 0  ;;  %s30_s20 = sshll.u32 %s611_s1, 4  ;;  %s31_s20 = int_to_ptr.hbm [resolvable:$true] %s30_s20 }
   0x2   :  { %12 = vsyncpa [#allocation5], 0  ;;  %s537_s21 = smov [#allocation6]   ;;  %s17_s25 = sshll.u32 %s610_s0, 4  ;;  %s18_s25 = int_to_ptr.hbm [resolvable:$true] %s17_s25 }
   0x3   :  { %s32_s22 = sshll.u32 %s537_s21, 4  ;;  %s538_s26 = smov 64   ;;  %s33_s22 = int_to_ptr.vmem [resolvable:$true] %s32_s22 }
   0x4   :  { %s539_s27 = smov 4   ;;  %s540_s28 = smov [#allocation3]  }
   0x5   :  { %38 = dma.hbm_to_vmem [thread:$0]  %s31_s20, 1024, %s33_s22, [#allocation7], %s538_s26, %s538_s26, %s539_s27  }
   0x6   :  { %s19_s29 = sshll.u32 %s540_s28, 4  ;;  %s541_s30 = smov 128   ;;  %s20_s29 = int_to_ptr.vmem [resolvable:$true] %s19_s29 }
   0x7   :  { %s542_s6 = smov 8   ;;  %s45_s8 = sshll.u32 %s613_s3, 4  ;;  %s46_s8 = int_to_ptr.hbm [resolvable:$true] %s45_s8 }
   0x8   :  { %25 = dma.hbm_to_vmem [thread:$0]  %s18_s25, 256, %s20_s29, [#allocation4], %s541_s30, %s541_s30, %s542_s6  }
   0x9   :  { %s543_s9 = smov [#allocation8]  }
   0xa   :  { %s47_s0 = sshll.u32 %s543_s9, 4  ;;  %s48_s0 = int_to_ptr.vmem [resolvable:$true] %s47_s0 }
   0xb   :  { %53 = dma.hbm_to_vmem [thread:$0]  %s46_s8, 1024, %s48_s0, [#allocation7], %s538_s26, %s538_s26, %s539_s27  }
   0xc   :  { %531 = dma.done.wait [#allocation4], 256  }
   0xd   :  { %532 = vsyncadd [#allocation4], 4294967040 }
   0xe   :  { %533 = dma.done.wait [#allocation7], 2048  }
   0xf   :  { %534 = vsyncadd [#allocation7], 4294965248  ;;  %v408_v0 = vld [vmem:[#allocation6 + $0x38] sm:$0xff]  ;;  %v407_v1 = vld [vmem:[#allocation6 + $0x30] sm:$0xff]  ;;  %s544_s12 = smov [#allocation9]   ;;  %s323_s16 = sshll.u32 %s615_s5, 4  ;;  %s324_s16 = int_to_ptr.hbm [resolvable:$true] %s323_s16 }
  0x10   :  { %145 = vmatpush.bf16.xpose.msra.mxu0 %v408_v0  ;;  %v406_v2 = vld [vmem:[#allocation6 + $0x28] sm:$0xff]  ;;  %v405_v3 = vld [vmem:[#allocation6 + $0x20] sm:$0xff]  ;;  %v404_v4 = vld [vmem:[#allocation6 + $0x18] sm:$0xff]  ;;  %s321_s13 = sshll.u32 %s544_s12, 4  ;;  %s322_s13 = int_to_ptr.vmem [resolvable:$true] %s321_s13 }
  0x11   :  { %v403_v5 = vld [vmem:[#allocation6 + $0x10] sm:$0xff]  ;;  %v402_v6 = vld [vmem:[#allocation6 + $0x8] sm:$0xff]  ;;  %v401_v7 = vld [vmem:[#allocation6] sm:$0xff] }
  0x12   :  { %v74_v8 = vld [vmem:[#allocation3] sm:$0xff]  ;;  %v75_v9 = vld [vmem:[#allocation3 + $0x8] sm:$0xff]  ;;  %v414_v13 = vld [vmem:[#allocation8 + $0x28] sm:$0xff] }
  0x13   :  { %v76_v10 = vpack.c.bf16 %v75_v9, %v74_v8  ;;  %v416_v11 = vld [vmem:[#allocation8 + $0x38] sm:$0xff]  ;;  %v415_v12 = vld [vmem:[#allocation8 + $0x30] sm:$0xff]  ;;  %v413_v15 = vld [vmem:[#allocation8 + $0x20] sm:$0xff] }
  0x14   :  { %286 = vmatpush.bf16.msra.mxu1 %v416_v11  ;;  %v425_v14 = vld [vmem:[%s612_s2] ss:$0 sm:$0xff]  ;;  %v412_v19 = vld [vmem:[#allocation8 + $0x18] sm:$0xff]  ;;  %v410_v25 = vld [vmem:[#allocation8 + $0x8] sm:$0xff] }
  0x15   :  { %v411_v22 = vld [vmem:[#allocation8 + $0x10] sm:$0xff]  ;;  %v409_v28 = vld [vmem:[#allocation8] sm:$0xff] }
  0x16   :  { %v426_v11 = vld [vmem:[%s614_s4] ss:$0 sm:$0xff] }
  0x18   :  { %146 = vmatpush.bf16.xpose.msra.mxu0 %v407_v1  ;;  %287 = vmatpush.bf16.msra.mxu1 %v415_v12 }
  0x1c   :  { %288 = vmatpush.bf16.msra.mxu1 %v414_v13 }
  0x20   :  { %147 = vmatpush.bf16.xpose.msra.mxu0 %v406_v2  ;;  %289 = vmatpush.bf16.msra.mxu1 %v413_v15 }
  0x24   :  { %290 = vmatpush.bf16.msra.mxu1 %v412_v19 }
  0x28   :  { %148 = vmatpush.bf16.xpose.msra.mxu0 %v405_v3  ;;  %291 = vmatpush.bf16.msra.mxu1 %v411_v22 }
  0x2c   :  { %292 = vmatpush.bf16.msra.mxu1 %v410_v25 }
  0x30   :  { %149 = vmatpush.bf16.xpose.msra.mxu0 %v404_v4  ;;  %293 = vmatpush.bf16.msra.mxu1 %v409_v28 }
  0x38   :  { %150 = vmatpush.bf16.xpose.msra.mxu0 %v403_v5 }
  0x40   :  { %151 = vmatpush.bf16.xpose.msra.mxu0 %v402_v6 }
  0x48   :  { %152 = vmatpush.bf16.xpose.msra.mxu0 %v401_v7 }
  0x4f   :  { %153 = vmatmul.bf16.vlgmr.msra.gmra.mxu0 %v76_v10 }
  0xcc   :  { %v154_v16 = vpop.f32.mrf.mxu0 }
  0xcd   :  { %v590_v17 = vadd.f32 %v425_v14, %v154_v16 }
  0xcf   :  { %v159_v18 = vand.u32 2147483647, %v590_v17  ;;  %vm169_vm0 = vcmp.ge.f32.partialorder %v590_v17, 0.0 }
  0xd1   :  { %v161_v20 = vsub.f32 0.0, %v159_v18 }
  0xd3   :  { %v163_v21 = vmul.f32 1.442695, %v161_v20 }
  0xd4   :  { %v156_v23 = vpop.f32.mrf.mxu0 }
  0xd5   :  { %427 = vpow2.f32 %v163_v21  ;;  %v157_v24 = vadd.f32 %v425_v14, %v156_v23 }
  0xd7   :  { %v160_v26 = vand.u32 2147483647, %v157_v24  ;;  %vm170_vm1 = vcmp.ge.f32.partialorder %v157_v24, 0.0 }
  0xd9   :  { %v162_v27 = vsub.f32 0.0, %v160_v26 }
  0xdb   :  { %v428_v29 = vpop.eup %427  ;;  %v165_v30 = vmul.f32 1.442695, %v162_v27 }
  0xdc   :  { %v167_v31 = vmul.f32 %v428_v29, %v428_v29  ;;  %v171_v32 = vmul.f32 2.0, %v428_v29 }
  0xdd   :  { %429 = vpow2.f32 %v165_v30 }
  0xde   :  { %v173_v33 = vadd.f32 1.0, %v171_v32  ;;  %v175_v34 = vadd.f32 %v171_v32, %v167_v31  ;;  %v179_v35 = vmul.f32 2.0, %v167_v31 }
  0xe0   :  { %v181_v36 = vadd.f32 %v179_v35, %v173_v33  ;;  %v183_v37 = vadd.f32 2.0, %v175_v34  ;;  %v177_v62 = vsel %vm169_vm0, %v173_v33, %v175_v34 }
  0xe1   :  { %v187_v4 = vmul.f32 %v177_v62, %v590_v17 }
  0xe2   :  { %v185_v38 = vsel %vm169_vm0, %v181_v36, %v183_v37 }
  0xe3   :  { %v430_v39 = vpop.eup %429  ;;  %431 = vrcp.f32 %v185_v38  ;;  %v200_v55 = vand.u32 2147483648, %v185_v38  ;;  %vm194_vm3 = vweird.f32 %v185_v38  ;;  %v198_v57 = vand.u32 2147483647, %v185_v38 }
  0xe4   :  { %v168_v40 = vmul.f32 %v430_v39, %v430_v39  ;;  %v172_v41 = vmul.f32 2.0, %v430_v39 }
  0xe5   :  { %v201_v0 = vor.u32 1.1754944e-38, %v200_v55  ;;  %vm199_vm6 = vcmp.eq.f32.partialorder %v198_v57, 8.507059e+37 }
  0xe6   :  { %v174_v42 = vadd.f32 1.0, %v172_v41  ;;  %v176_v43 = vadd.f32 %v172_v41, %v168_v40  ;;  %v180_v44 = vmul.f32 2.0, %v168_v40 }
  0xe8   :  { %v182_v45 = vadd.f32 %v180_v44, %v174_v42  ;;  %v184_v46 = vadd.f32 2.0, %v176_v43  ;;  %v178_v63 = vsel %vm170_vm1, %v174_v42, %v176_v43 }
  0xe9   :  { %v432_v47 = vpop.eup %431  ;;  %v188_v5 = vmul.f32 %v178_v63, %v157_v24 }
  0xea   :  { %v190_v48 = vmul.f32 %v432_v47, %v185_v38  ;;  %v186_v49 = vsel %vm170_vm1, %v182_v45, %v184_v46  ;;  %vm195_vm2 = vweird.f32 %v432_v47 }
  0xeb   :  { %433 = vrcp.f32 %v186_v49  ;;  %vm196_vm4 = vmor %vm194_vm3, %vm195_vm2  ;;  %v214_v58 = vand.u32 2147483648, %v186_v49  ;;  %v212_v61 = vand.u32 2147483647, %v186_v49  ;;  %vm208_vm7 = vweird.f32 %v186_v49 }
  0xec   :  { %v191_v50 = vsub.f32 1.0, %v190_v48 }
  0xed   :  { %v215_v3 = vor.u32 1.1754944e-38, %v214_v58  ;;  %vm213_vm9 = vcmp.eq.f32.partialorder %v212_v61, 8.507059e+37 }
  0xee   :  { %v192_v51 = vmul.f32 %v432_v47, %v191_v50 }
  0xf0   :  { %v193_v54 = vadd.f32 %v432_v47, %v192_v51 }
  0xf1   :  { %v434_v52 = vpop.eup %433 }
  0xf2   :  { %v204_v53 = vmul.f32 %v434_v52, %v186_v49  ;;  %v197_v59 = vsel %vm196_vm4, %v432_v47, %v193_v54  ;;  %vm209_vm5 = vweird.f32 %v434_v52 }
  0xf3   :  { %v202_v2 = vsel %vm199_vm6, %v201_v0, %v197_v59  ;;  %vm210_vm8 = vmor %vm208_vm7, %vm209_vm5 }
  0xf4   :  { %v205_v56 = vsub.f32 1.0, %v204_v53  ;;  %v217_v8 = vmul.f32 %v202_v2, %v187_v4 }
  0xf6   :  { %v206_v60 = vmul.f32 %v434_v52, %v205_v56 }
  0xf8   :  { %v207_v1 = vadd.f32 %v434_v52, %v206_v60 }
  0xfa   :  { %v211_v6 = vsel %vm210_vm8, %v434_v52, %v207_v1 }
  0xfb   :  { %v216_v7 = vsel %vm213_vm9, %v215_v3, %v211_v6 }
  0xfc   :  { %v218_v9 = vmul.f32 %v216_v7, %v188_v5 }
  0xfe   :  { %v221_v10 = vpack.c.bf16 %v218_v9, %v217_v8 }
 0x100   :  { %294 = vmatmul.bf16.vlgmr.msra.gmra.mxu1 %v221_v10 }
 0x17d   :  { %v295_v12 = vpop.f32.mrf.mxu1 }
 0x17e   :  { %v313_v13 = vadd.f32 %v426_v11, %v295_v12 }
 0x180   :  { %315 = vst [vmem:[#allocation9] sm:$0xff] %v313_v13 }
 0x185   :  { %v297_v14 = vpop.f32.mrf.mxu1 }
 0x186   :  { %v314_v15 = vadd.f32 %v426_v11, %v297_v14 }
 0x188   :  { %316 = vst [vmem:[#allocation9 + $0x8] sm:$0xff] %v314_v15 }
 0x189   :  { %329 = dma.vmem_to_hbm [thread:$0]  %s322_s13, 256, %s324_s16, [#allocation5], %s541_s30, %s541_s30, %s542_s6  }
 0x18a   :  { %535 = dma.done.wait [#allocation5], 256  }
 0x18b   :  { %536 = vsyncadd [#allocation5], 4294967040 }
 0x18c   :  { %334 = vsyncpa [#allocation4], 1 }
 0x18d   :  { %335 = vsyncpa [#allocation7], 1 }
 0x18e   :  { %336 = vsyncpa [#allocation5], 1 }

</bundles_post_ra>
